<compile_context>
chip_gen: v5e
topology: v5e:2x2
jax: 0.10.0
libtpu: 0.0.40
codegen_flags: <defaults>
</compile_context>

<pallas_src>
import functools

import jax
import jax.numpy as jnp
from jax.experimental import pallas as pl
from jax.experimental.pallas import tpu as pltpu

# ---- problem sizes (small, consistent with the module's forward) ------------
BATCH = 2          # batch_size
SEQ = 8            # seq_len
HID = 32           # bert hidden size (768 in the real model)
KH = 11            # conv kernel height
PAD = 5            # conv padding along seq
C_OUT = 64         # conv out_channels
NUM_LABELS = 4     # config.num_labels


def _bert_cnn_kernel(x_ref, wconv_ref, bconv_ref, wcls_ref, bcls_ref, out_ref,
                     *, seq_len, kh):
    # Per grid step (one batch element):
    # x_ref:     (1, S+2*PAD, HID)    bf16, pre-padded in the wrapper
    # wconv_ref: (KH, HID, C_OUT)     bf16 conv weight, taps-major
    # bconv_ref: (1, C_OUT)           f32
    # wcls_ref:  (C_OUT, NUM_LABELS)  f32 classifier weight (transposed)
    # bcls_ref:  (1, NUM_LABELS)      f32
    # out_ref:   (1, 1, NUM_LABELS)   f32 softmax(logits) for this batch row

    # Conv(11, HID) as shift-and-accumulate: KH dots with K=HID, f32 accumulate.
    # Static KH loop (11 taps) with static ref slices; no im2col LHS is built.
    acc = jnp.dot(x_ref[0, 0:seq_len, :], wconv_ref[0],
                  preferred_element_type=jnp.float32)
    for k in range(1, kh):
        acc = acc + jnp.dot(x_ref[0, k:k + seq_len, :], wconv_ref[k],
                            preferred_element_type=jnp.float32)

    # Bias + ReLU (f32 epilogue), then max_pool2d(kernel=(S, 1)).
    acc = jnp.maximum(acc + bconv_ref[...], 0.0)          # (S, C_OUT)
    pooled = jnp.max(acc, axis=0, keepdims=True)          # (1, C_OUT)

    # Classifier (tiny matmul, kept f32) + Softmax(dim=1).
    logits = jnp.dot(pooled, wcls_ref[...],
                     preferred_element_type=jnp.float32) + bcls_ref[...]
    m = jnp.max(logits, axis=-1, keepdims=True)
    e = jnp.exp(logits - m)
    out_ref[0] = e / jnp.sum(e, axis=-1, keepdims=True)


def prepare_params(conv_w, conv_b, cls_w, cls_b):
    """One-time weight re-layout + dtype casts (kept out of the forward path)."""
    c_out = conv_w.shape[0]
    # (C_OUT, 1, KH, HID) -> (KH, HID, C_OUT), bf16 for the MXU.
    wconv = jnp.transpose(conv_w[:, 0, :, :], (1, 2, 0)).astype(jnp.bfloat16)
    bconv = conv_b.reshape(1, c_out).astype(jnp.float32)
    wcls = jnp.transpose(cls_w, (1, 0)).astype(jnp.float32)   # (C_OUT, L)
    bcls = cls_b.reshape(1, -1).astype(jnp.float32)
    return wconv, bconv, wcls, bcls


def bert_cnn_head(bert_output, wconv, bconv, wcls, bcls):
    """bert_output: (B, S, HID) -> softmax probs (B, NUM_LABELS)."""
    B, S, H = bert_output.shape
    kh, _, c_out = wconv.shape
    num_labels = wcls.shape[1]
    pad = (kh - 1) // 2
    s_pad = S + 2 * pad

    # Pad once in the wrapper (tiny HBM cost); cast to bf16 for the MXU path.
    x_pad = jnp.pad(bert_output.astype(jnp.bfloat16),
                    ((0, 0), (pad, pad), (0, 0)))

    kernel = functools.partial(_bert_cnn_kernel, seq_len=S, kh=kh)

    cost = pl.CostEstimate(
        flops=2 * B * S * kh * H * c_out + 2 * B * c_out * num_labels,
        transcendentals=B * num_labels,
        bytes_accessed=(x_pad.size * 2 + wconv.size * 2
                        + bconv.size * 4 + wcls.size * 4 + bcls.size * 4
                        + B * num_labels * 4),
    )

    out = pl.pallas_call(
        kernel,
        out_shape=jax.ShapeDtypeStruct((B, 1, num_labels), jnp.float32),
        grid=(B,),
        in_specs=[
            pl.BlockSpec((1, s_pad, H), lambda b: (b, 0, 0)),       # activations
            pl.BlockSpec((kh, H, c_out), lambda b: (0, 0, 0)),      # conv weight
            pl.BlockSpec((1, c_out), lambda b: (0, 0)),             # conv bias
            pl.BlockSpec((c_out, num_labels), lambda b: (0, 0)),    # cls weight
            pl.BlockSpec((1, num_labels), lambda b: (0, 0)),        # cls bias
        ],
        out_specs=pl.BlockSpec((1, 1, num_labels), lambda b: (b, 0, 0)),
        compiler_params=pltpu.CompilerParams(
            # batch axis is independent -> megacore-shardable on v7x
            dimension_semantics=("parallel",),
            # explicit scoped-VMEM budget (safe on v5e/v6e/v7x); at real BERT
            # sizes re-budget against the chip (64 MiB total on v7x).
            vmem_limit_bytes=32 * 1024 * 1024,
        ),
        cost_estimate=cost,
    )(x_pad, wconv, bconv, wcls, bcls)
    return out.reshape(B, num_labels)


def _reference(bert_output, conv_w, conv_b, cls_w, cls_b):
    """Pure-JAX reference of the same head (same bf16 MXU-input convention)."""
    B, S, H = bert_output.shape
    x_pad = jnp.pad(bert_output, ((0, 0), (PAD, PAD), (0, 0))).astype(jnp.bfloat16)
    wconv = jnp.transpose(conv_w[:, 0, :, :], (1, 2, 0)).astype(jnp.bfloat16)
    acc = jnp.zeros((B, S, C_OUT), jnp.float32)
    for k in range(KH):
        acc = acc + jnp.einsum('bsh,hc->bsc', x_pad[:, k:k + S, :], wconv[k],
                               preferred_element_type=jnp.float32)
    acc = jnp.maximum(acc + conv_b[None, None, :].astype(jnp.float32), 0.0)
    pooled = jnp.max(acc, axis=1)                       # (B, C_OUT)
    logits = pooled @ cls_w.T + cls_b                   # (B, NUM_LABELS)
    return jax.nn.softmax(logits, axis=1)


if __name__ == "__main__":
    key = jax.random.PRNGKey(0)
    k_x, k_cw, k_cb, k_lw, k_lb = jax.random.split(key, 5)

    # Deterministic synthetic BERT sequence output and head parameters.
    bert_output = jax.random.normal(k_x, (BATCH, SEQ, HID), jnp.float32)
    conv_w = 0.1 * jax.random.normal(k_cw, (C_OUT, 1, KH, HID), jnp.float32)
    conv_b = 0.1 * jax.random.normal(k_cb, (C_OUT,), jnp.float32)
    cls_w = 0.1 * jax.random.normal(k_lw, (NUM_LABELS, C_OUT), jnp.float32)
    cls_b = 0.1 * jax.random.normal(k_lb, (NUM_LABELS,), jnp.float32)

    # One-time weight re-layout (hoisted out of the per-call path).
    wconv, bconv, wcls, bcls = prepare_params(conv_w, conv_b, cls_w, cls_b)

    probs = bert_cnn_head(bert_output, wconv, bconv, wcls, bcls)
    probs = jax.block_until_ready(probs)

    ref = _reference(bert_output, conv_w, conv_b, cls_w, cls_b)
    assert probs.shape == (BATCH, NUM_LABELS)
    assert jnp.allclose(probs, ref, atol=1e-4, rtol=1e-4), "mismatch vs reference"
    assert jnp.allclose(jnp.sum(probs, axis=1), 1.0, atol=1e-5)

    print("KERNEL_OK")
</pallas_src>

<mosaic_0001>
module attributes {stable_mosaic.version = 11 : i64} {
  func.func @_bert_cnn_kernel(%arg0: i32, %arg1: memref<1x18x32xbf16, #tpu.memory_space<vmem>>, %arg2: memref<11x32x64xbf16, #tpu.memory_space<vmem>>, %arg3: memref<1x64xf32, #tpu.memory_space<vmem>>, %arg4: memref<64x4xf32, #tpu.memory_space<vmem>>, %arg5: memref<1x4xf32, #tpu.memory_space<vmem>>, %arg6: memref<1x1x4xf32, #tpu.memory_space<vmem>>) attributes {dimension_semantics = [#tpu.dimension_semantics<parallel>], iteration_bounds = array<i64: 2>, scalar_prefetch = 0 : i64, scratch_operands = 0 : i64, tpu.core_type = #tpu.core_type<tc>, window_params = [{transform_indices = @transform_0, window_bounds = array<i64: 1, 18, 32>}, {pipeline_mode = #tpu.pipeline_mode<synchronous>, transform_indices = @transform_1, window_bounds = array<i64: 11, 32, 64>}, {pipeline_mode = #tpu.pipeline_mode<synchronous>, transform_indices = @transform_2, window_bounds = array<i64: 1, 64>}, {pipeline_mode = #tpu.pipeline_mode<synchronous>, transform_indices = @transform_3, window_bounds = array<i64: 64, 4>}, {pipeline_mode = #tpu.pipeline_mode<synchronous>, transform_indices = @transform_4, window_bounds = array<i64: 1, 4>}, {transform_indices = @transform_5, window_bounds = array<i64: 1, 1, 4>}]} {
    %c0 = arith.constant 0 : index
    %c0_0 = arith.constant 0 : index
    %c0_1 = arith.constant 0 : index
    %0 = vector.load %arg1[%c0, %c0_0, %c0_1] : memref<1x18x32xbf16, #tpu.memory_space<vmem>>, vector<1x8x32xbf16>
    %1 = vector.shape_cast %0 : vector<1x8x32xbf16> to vector<8x32xbf16>
    %c0_2 = arith.constant 0 : index
    %c0_3 = arith.constant 0 : index
    %c0_4 = arith.constant 0 : index
    %2 = vector.load %arg2[%c0_2, %c0_3, %c0_4] : memref<11x32x64xbf16, #tpu.memory_space<vmem>>, vector<1x32x64xbf16>
    %3 = vector.shape_cast %2 : vector<1x32x64xbf16> to vector<32x64xbf16>
    %cst = arith.constant dense<0.000000e+00> : vector<8x64xf32>
    %4 = tpu.matmul %1, %3, %cst {dimension_numbers = #tpu.dot_dimension_numbers<[1], [0], [0], [1], [0, 0, 1, 1], [], []>} : vector<8x32xbf16>, vector<32x64xbf16>, vector<8x64xf32> -> vector<8x64xf32>
    %c0_5 = arith.constant 0 : index
    %c1 = arith.constant 1 : index
    %c0_6 = arith.constant 0 : index
    %5 = vector.load %arg1[%c0_5, %c1, %c0_6] : memref<1x18x32xbf16, #tpu.memory_space<vmem>>, vector<1x8x32xbf16>
    %6 = vector.shape_cast %5 : vector<1x8x32xbf16> to vector<8x32xbf16>
    %c1_7 = arith.constant 1 : index
    %c0_8 = arith.constant 0 : index
    %c0_9 = arith.constant 0 : index
    %7 = vector.load %arg2[%c1_7, %c0_8, %c0_9] : memref<11x32x64xbf16, #tpu.memory_space<vmem>>, vector<1x32x64xbf16>
    %8 = vector.shape_cast %7 : vector<1x32x64xbf16> to vector<32x64xbf16>
    %cst_10 = arith.constant dense<0.000000e+00> : vector<8x64xf32>
    %9 = tpu.matmul %6, %8, %cst_10 {dimension_numbers = #tpu.dot_dimension_numbers<[1], [0], [0], [1], [0, 0, 1, 1], [], []>} : vector<8x32xbf16>, vector<32x64xbf16>, vector<8x64xf32> -> vector<8x64xf32>
    %10 = arith.addf %4, %9 : vector<8x64xf32>
    %c0_11 = arith.constant 0 : index
    %c2 = arith.constant 2 : index
    %c0_12 = arith.constant 0 : index
    %11 = vector.load %arg1[%c0_11, %c2, %c0_12] : memref<1x18x32xbf16, #tpu.memory_space<vmem>>, vector<1x8x32xbf16>
    %12 = vector.shape_cast %11 : vector<1x8x32xbf16> to vector<8x32xbf16>
    %c2_13 = arith.constant 2 : index
    %c0_14 = arith.constant 0 : index
    %c0_15 = arith.constant 0 : index
    %13 = vector.load %arg2[%c2_13, %c0_14, %c0_15] : memref<11x32x64xbf16, #tpu.memory_space<vmem>>, vector<1x32x64xbf16>
    %14 = vector.shape_cast %13 : vector<1x32x64xbf16> to vector<32x64xbf16>
    %cst_16 = arith.constant dense<0.000000e+00> : vector<8x64xf32>
    %15 = tpu.matmul %12, %14, %cst_16 {dimension_numbers = #tpu.dot_dimension_numbers<[1], [0], [0], [1], [0, 0, 1, 1], [], []>} : vector<8x32xbf16>, vector<32x64xbf16>, vector<8x64xf32> -> vector<8x64xf32>
    %16 = arith.addf %10, %15 : vector<8x64xf32>
    %c0_17 = arith.constant 0 : index
    %c3 = arith.constant 3 : index
    %c0_18 = arith.constant 0 : index
    %17 = vector.load %arg1[%c0_17, %c3, %c0_18] : memref<1x18x32xbf16, #tpu.memory_space<vmem>>, vector<1x8x32xbf16>
    %18 = vector.shape_cast %17 : vector<1x8x32xbf16> to vector<8x32xbf16>
    %c3_19 = arith.constant 3 : index
    %c0_20 = arith.constant 0 : index
    %c0_21 = arith.constant 0 : index
    %19 = vector.load %arg2[%c3_19, %c0_20, %c0_21] : memref<11x32x64xbf16, #tpu.memory_space<vmem>>, vector<1x32x64xbf16>
    %20 = vector.shape_cast %19 : vector<1x32x64xbf16> to vector<32x64xbf16>
    %cst_22 = arith.constant dense<0.000000e+00> : vector<8x64xf32>
    %21 = tpu.matmul %18, %20, %cst_22 {dimension_numbers = #tpu.dot_dimension_numbers<[1], [0], [0], [1], [0, 0, 1, 1], [], []>} : vector<8x32xbf16>, vector<32x64xbf16>, vector<8x64xf32> -> vector<8x64xf32>
    %22 = arith.addf %16, %21 : vector<8x64xf32>
    %c0_23 = arith.constant 0 : index
    %c4 = arith.constant 4 : index
    %c0_24 = arith.constant 0 : index
    %23 = vector.load %arg1[%c0_23, %c4, %c0_24] : memref<1x18x32xbf16, #tpu.memory_space<vmem>>, vector<1x8x32xbf16>
    %24 = vector.shape_cast %23 : vector<1x8x32xbf16> to vector<8x32xbf16>
    %c4_25 = arith.constant 4 : index
    %c0_26 = arith.constant 0 : index
    %c0_27 = arith.constant 0 : index
    %25 = vector.load %arg2[%c4_25, %c0_26, %c0_27] : memref<11x32x64xbf16, #tpu.memory_space<vmem>>, vector<1x32x64xbf16>
    %26 = vector.shape_cast %25 : vector<1x32x64xbf16> to vector<32x64xbf16>
    %cst_28 = arith.constant dense<0.000000e+00> : vector<8x64xf32>
    %27 = tpu.matmul %24, %26, %cst_28 {dimension_numbers = #tpu.dot_dimension_numbers<[1], [0], [0], [1], [0, 0, 1, 1], [], []>} : vector<8x32xbf16>, vector<32x64xbf16>, vector<8x64xf32> -> vector<8x64xf32>
    %28 = arith.addf %22, %27 : vector<8x64xf32>
    %c0_29 = arith.constant 0 : index
    %c5 = arith.constant 5 : index
    %c0_30 = arith.constant 0 : index
    %29 = vector.load %arg1[%c0_29, %c5, %c0_30] : memref<1x18x32xbf16, #tpu.memory_space<vmem>>, vector<1x8x32xbf16>
    %30 = vector.shape_cast %29 : vector<1x8x32xbf16> to vector<8x32xbf16>
    %c5_31 = arith.constant 5 : index
    %c0_32 = arith.constant 0 : index
    %c0_33 = arith.constant 0 : index
    %31 = vector.load %arg2[%c5_31, %c0_32, %c0_33] : memref<11x32x64xbf16, #tpu.memory_space<vmem>>, vector<1x32x64xbf16>
    %32 = vector.shape_cast %31 : vector<1x32x64xbf16> to vector<32x64xbf16>
    %cst_34 = arith.constant dense<0.000000e+00> : vector<8x64xf32>
    %33 = tpu.matmul %30, %32, %cst_34 {dimension_numbers = #tpu.dot_dimension_numbers<[1], [0], [0], [1], [0, 0, 1, 1], [], []>} : vector<8x32xbf16>, vector<32x64xbf16>, vector<8x64xf32> -> vector<8x64xf32>
    %34 = arith.addf %28, %33 : vector<8x64xf32>
    %c0_35 = arith.constant 0 : index
    %c6 = arith.constant 6 : index
    %c0_36 = arith.constant 0 : index
    %35 = vector.load %arg1[%c0_35, %c6, %c0_36] : memref<1x18x32xbf16, #tpu.memory_space<vmem>>, vector<1x8x32xbf16>
    %36 = vector.shape_cast %35 : vector<1x8x32xbf16> to vector<8x32xbf16>
    %c6_37 = arith.constant 6 : index
    %c0_38 = arith.constant 0 : index
    %c0_39 = arith.constant 0 : index
    %37 = vector.load %arg2[%c6_37, %c0_38, %c0_39] : memref<11x32x64xbf16, #tpu.memory_space<vmem>>, vector<1x32x64xbf16>
    %38 = vector.shape_cast %37 : vector<1x32x64xbf16> to vector<32x64xbf16>
    %cst_40 = arith.constant dense<0.000000e+00> : vector<8x64xf32>
    %39 = tpu.matmul %36, %38, %cst_40 {dimension_numbers = #tpu.dot_dimension_numbers<[1], [0], [0], [1], [0, 0, 1, 1], [], []>} : vector<8x32xbf16>, vector<32x64xbf16>, vector<8x64xf32> -> vector<8x64xf32>
    %40 = arith.addf %34, %39 : vector<8x64xf32>
    %c0_41 = arith.constant 0 : index
    %c7 = arith.constant 7 : index
    %c0_42 = arith.constant 0 : index
    %41 = vector.load %arg1[%c0_41, %c7, %c0_42] : memref<1x18x32xbf16, #tpu.memory_space<vmem>>, vector<1x8x32xbf16>
    %42 = vector.shape_cast %41 : vector<1x8x32xbf16> to vector<8x32xbf16>
    %c7_43 = arith.constant 7 : index
    %c0_44 = arith.constant 0 : index
    %c0_45 = arith.constant 0 : index
    %43 = vector.load %arg2[%c7_43, %c0_44, %c0_45] : memref<11x32x64xbf16, #tpu.memory_space<vmem>>, vector<1x32x64xbf16>
    %44 = vector.shape_cast %43 : vector<1x32x64xbf16> to vector<32x64xbf16>
    %cst_46 = arith.constant dense<0.000000e+00> : vector<8x64xf32>
    %45 = tpu.matmul %42, %44, %cst_46 {dimension_numbers = #tpu.dot_dimension_numbers<[1], [0], [0], [1], [0, 0, 1, 1], [], []>} : vector<8x32xbf16>, vector<32x64xbf16>, vector<8x64xf32> -> vector<8x64xf32>
    %46 = arith.addf %40, %45 : vector<8x64xf32>
    %c0_47 = arith.constant 0 : index
    %c8 = arith.constant 8 : index
    %c0_48 = arith.constant 0 : index
    %47 = vector.load %arg1[%c0_47, %c8, %c0_48] : memref<1x18x32xbf16, #tpu.memory_space<vmem>>, vector<1x8x32xbf16>
    %48 = vector.shape_cast %47 : vector<1x8x32xbf16> to vector<8x32xbf16>
    %c8_49 = arith.constant 8 : index
    %c0_50 = arith.constant 0 : index
    %c0_51 = arith.constant 0 : index
    %49 = vector.load %arg2[%c8_49, %c0_50, %c0_51] : memref<11x32x64xbf16, #tpu.memory_space<vmem>>, vector<1x32x64xbf16>
    %50 = vector.shape_cast %49 : vector<1x32x64xbf16> to vector<32x64xbf16>
    %cst_52 = arith.constant dense<0.000000e+00> : vector<8x64xf32>
    %51 = tpu.matmul %48, %50, %cst_52 {dimension_numbers = #tpu.dot_dimension_numbers<[1], [0], [0], [1], [0, 0, 1, 1], [], []>} : vector<8x32xbf16>, vector<32x64xbf16>, vector<8x64xf32> -> vector<8x64xf32>
    %52 = arith.addf %46, %51 : vector<8x64xf32>
    %c0_53 = arith.constant 0 : index
    %c9 = arith.constant 9 : index
    %c0_54 = arith.constant 0 : index
    %53 = vector.load %arg1[%c0_53, %c9, %c0_54] : memref<1x18x32xbf16, #tpu.memory_space<vmem>>, vector<1x8x32xbf16>
    %54 = vector.shape_cast %53 : vector<1x8x32xbf16> to vector<8x32xbf16>
    %c9_55 = arith.constant 9 : index
    %c0_56 = arith.constant 0 : index
    %c0_57 = arith.constant 0 : index
    %55 = vector.load %arg2[%c9_55, %c0_56, %c0_57] : memref<11x32x64xbf16, #tpu.memory_space<vmem>>, vector<1x32x64xbf16>
    %56 = vector.shape_cast %55 : vector<1x32x64xbf16> to vector<32x64xbf16>
    %cst_58 = arith.constant dense<0.000000e+00> : vector<8x64xf32>
    %57 = tpu.matmul %54, %56, %cst_58 {dimension_numbers = #tpu.dot_dimension_numbers<[1], [0], [0], [1], [0, 0, 1, 1], [], []>} : vector<8x32xbf16>, vector<32x64xbf16>, vector<8x64xf32> -> vector<8x64xf32>
    %58 = arith.addf %52, %57 : vector<8x64xf32>
    %c0_59 = arith.constant 0 : index
    %c10 = arith.constant 10 : index
    %c0_60 = arith.constant 0 : index
    %59 = vector.load %arg1[%c0_59, %c10, %c0_60] : memref<1x18x32xbf16, #tpu.memory_space<vmem>>, vector<1x8x32xbf16>
    %60 = vector.shape_cast %59 : vector<1x8x32xbf16> to vector<8x32xbf16>
    %c10_61 = arith.constant 10 : index
    %c0_62 = arith.constant 0 : index
    %c0_63 = arith.constant 0 : index
    %61 = vector.load %arg2[%c10_61, %c0_62, %c0_63] : memref<11x32x64xbf16, #tpu.memory_space<vmem>>, vector<1x32x64xbf16>
    %62 = vector.shape_cast %61 : vector<1x32x64xbf16> to vector<32x64xbf16>
    %cst_64 = arith.constant dense<0.000000e+00> : vector<8x64xf32>
    %63 = tpu.matmul %60, %62, %cst_64 {dimension_numbers = #tpu.dot_dimension_numbers<[1], [0], [0], [1], [0, 0, 1, 1], [], []>} : vector<8x32xbf16>, vector<32x64xbf16>, vector<8x64xf32> -> vector<8x64xf32>
    %64 = arith.addf %58, %63 : vector<8x64xf32>
    %c0_65 = arith.constant 0 : index
    %c0_66 = arith.constant 0 : index
    %65 = vector.load %arg3[%c0_65, %c0_66] : memref<1x64xf32, #tpu.memory_space<vmem>>, vector<1x64xf32>
    %66 = vector.broadcast %65 : vector<1x64xf32> to vector<8x64xf32>
    %67 = arith.addf %64, %66 : vector<8x64xf32>
    %cst_67 = arith.constant 0.000000e+00 : f32
    %68 = vector.broadcast %cst_67 : f32 to vector<8x64xf32>
    %69 = arith.maximumf %67, %68 : vector<8x64xf32>
    %cst_68 = arith.constant dense<0xFF800000> : vector<64xf32>
    %70 = vector.multi_reduction <maximumf>, %69, %cst_68 [0] : vector<8x64xf32> to vector<64xf32>
    %71 = vector.shape_cast %70 : vector<64xf32> to vector<1x64xf32>
    %c0_69 = arith.constant 0 : index
    %c0_70 = arith.constant 0 : index
    %72 = vector.load %arg4[%c0_69, %c0_70] : memref<64x4xf32, #tpu.memory_space<vmem>>, vector<64x4xf32>
    %cst_71 = arith.constant dense<0.000000e+00> : vector<1x4xf32>
    %73 = tpu.matmul %71, %72, %cst_71 {dimension_numbers = #tpu.dot_dimension_numbers<[1], [0], [0], [1], [0, 0, 1, 1], [], []>} : vector<1x64xf32>, vector<64x4xf32>, vector<1x4xf32> -> vector<1x4xf32>
    %c0_72 = arith.constant 0 : index
    %c0_73 = arith.constant 0 : index
    %74 = vector.load %arg5[%c0_72, %c0_73] : memref<1x4xf32, #tpu.memory_space<vmem>>, vector<1x4xf32>
    %75 = arith.addf %73, %74 : vector<1x4xf32>
    %cst_74 = arith.constant dense<0xFF800000> : vector<1xf32>
    %76 = vector.multi_reduction <maximumf>, %75, %cst_74 [1] : vector<1x4xf32> to vector<1xf32>
    %77 = vector.shape_cast %76 : vector<1xf32> to vector<1x1xf32>
    %78 = vector.broadcast %77 : vector<1x1xf32> to vector<1x4xf32>
    %79 = arith.subf %75, %78 : vector<1x4xf32>
    %80 = math.exp %79 : vector<1x4xf32>
    %cst_75 = arith.constant dense<0.000000e+00> : vector<1xf32>
    %81 = vector.multi_reduction <add>, %80, %cst_75 [1] : vector<1x4xf32> to vector<1xf32>
    %82 = vector.shape_cast %81 : vector<1xf32> to vector<1x1xf32>
    %83 = vector.broadcast %82 : vector<1x1xf32> to vector<1x4xf32>
    %84 = arith.divf %80, %83 : vector<1x4xf32>
    %c0_76 = arith.constant 0 : index
    %c0_77 = arith.constant 0 : index
    %c0_78 = arith.constant 0 : index
    %85 = vector.load %arg6[%c0_76, %c0_77, %c0_78] : memref<1x1x4xf32, #tpu.memory_space<vmem>>, vector<1x1x4xf32>
    %86 = vector.shape_cast %85 : vector<1x1x4xf32> to vector<1x4xf32>
    %87 = vector.shape_cast %84 : vector<1x4xf32> to vector<1x1x4xf32>
    tpu.vector_store %arg6[%c0_76, %c0_77, %c0_78], %87 {strides = array<i32>} : memref<1x1x4xf32, #tpu.memory_space<vmem>>, vector<1x1x4xf32>,
    return
  }
  func.func @transform_0(%arg0: i32) -> (i32, i32, i32) {
    %c0_i32 = arith.constant 0 : i32
    %c0_i32_0 = arith.constant 0 : i32
    %c0_i32_1 = arith.constant 0 : i32
    return %arg0, %c0_i32, %c0_i32_0 : i32, i32, i32
  }
  func.func @transform_1(%arg0: i32) -> (i32, i32, i32) {
    %c0_i32 = arith.constant 0 : i32
    %c0_i32_0 = arith.constant 0 : i32
    %c0_i32_1 = arith.constant 0 : i32
    %c0_i32_2 = arith.constant 0 : i32
    return %c0_i32, %c0_i32_0, %c0_i32_1 : i32, i32, i32
  }
  func.func @transform_2(%arg0: i32) -> (i32, i32) {
    %c0_i32 = arith.constant 0 : i32
    %c0_i32_0 = arith.constant 0 : i32
    %c0_i32_1 = arith.constant 0 : i32
    return %c0_i32, %c0_i32_0 : i32, i32
  }
  func.func @transform_3(%arg0: i32) -> (i32, i32) {
    %c0_i32 = arith.constant 0 : i32
    %c0_i32_0 = arith.constant 0 : i32
    %c0_i32_1 = arith.constant 0 : i32
    return %c0_i32, %c0_i32_0 : i32, i32
  }
  func.func @transform_4(%arg0: i32) -> (i32, i32) {
    %c0_i32 = arith.constant 0 : i32
    %c0_i32_0 = arith.constant 0 : i32
    %c0_i32_1 = arith.constant 0 : i32
    return %c0_i32, %c0_i32_0 : i32, i32
  }
  func.func @transform_5(%arg0: i32) -> (i32, i32, i32) {
    %c0_i32 = arith.constant 0 : i32
    %c0_i32_0 = arith.constant 0 : i32
    %c0_i32_1 = arith.constant 0 : i32
    return %arg0, %c0_i32, %c0_i32_0 : i32, i32, i32
  }
}

</mosaic_0001>

<bundles_post_ra>
// kernel: tpu_custom_call.1
= control target key start
LH: loop header
LB: loop body
LE: loop exit
PB: predicated region body
PF: predicated region fallthrough
CT: control target
= control target key end

     0   :  { %10 = vsyncpa [#allocation3], 0  ;;  %s1334_s0 = inlined_call_operand.vmem [shape: bf16[2,18,32], index: 0, kind: input, shape index: {}]   ;;  %s1335_s1 = inlined_call_operand.hbm [shape: bf16[11,32,64], index: 1, kind: input, shape index: {}]   ;;  %s1336_s2 = inlined_call_operand.vmem [shape: f32[1,64], index: 2, kind: input, shape index: {}]   ;;  %s1337_s3 = inlined_call_operand.vmem [shape: f32[64,4], index: 3, kind: input, shape index: {}]   ;;  %s1338_s4 = inlined_call_operand.vmem [shape: f32[1,4], index: 4, kind: input, shape index: {}]   ;;  %s1339_s5 = inlined_call_operand.hbm [shape: f32[2,1,4], index: 5, kind: output, shape index: {}]  }
   0x1   :  { %11 = vsyncpa [#allocation4], 0 }
   0x2   :  { %13 = vsyncpa [#allocation4 + $0x1], 0  ;;  %s1168_s18 = smov 0   ;;  %s1170_s19 = smov 0  }
   0x3   :  { %s1172_s20 = smov 0   ;;  %s1174_s21 = smov 0  }
   0x4 LB: > { %s1189_s22 = sadd.s32 4294967295, %s1133_s21   ;;  %s848_s23 = sadd.s32 4294967294, %s1133_s21   ;;  %s1133_s21 = sphi %s1174_s21, %s1345_s21   ;;  %s1129_s20 = sphi %s1172_s20, %s1344_s20   ;;  %s1125_s19 = sphi %s1170_s19, %s1343_s19   ;;  %s1121_s18 = sphi %s1168_s18, %s1342_s18  }
   0x5   : > { %s1193_s24 = sadd.s32 1, %s1133_s21   ;;  %s136_s25 = sadd.s32 1, %s1129_s20 }
   0x6   : > { %s133_s26 = ssub.s32 %s1133_s21, %s1193_s24  ;;  %p146_p0 = scmp.ne.s32.totalorder %s1129_s20, %s1125_s19 }
   0x7   : > { %p134_p1 = scmp.eq.s32.totalorder %s133_s26, 0  ;;  %p147_p2 = scmp.eq.s32.totalorder %s1189_s22, 1 }
   0x8   : > { %p152_p3 = scmp.ne.s32.totalorder %s1125_s19, %s1121_s18  ;;  %p153_p4 = scmp.eq.s32.totalorder %s848_s23, 1 }
   0x9   : > { %s1204_s27 = scalar_select %p134_p1, %s1129_s20, %s136_s25  }
   0xa   : > { %p1206_p5 = por %p147_p2, %p146_p0  ;;  %p1210_p6 = por %p153_p4, %p152_p3 }
   0xb   : > { %p849_p7 = scmp.ge.s32.totalorder %s1133_s21, 1  ;;  %p160_p8 = scmp.lt.s32.totalorder %s1133_s21, 3 }
   0xc   : > { %p994_p9 = scmp.eq.s32.totalorder %s1189_s22, 0  ;;  %s171_s7 = sshll.u32 %s1335_s1, 4  ;;  %s172_s7 = int_to_ptr.hbm [resolvable:$true] %s171_s7 }
   0xd   : > { %p161_p10 = pnand %p849_p7, %p160_p8  ;;  %s1135_s8 = smov [#allocation2]  }
   0xe   : > { %s173_s9 = sshll.u32 %s1135_s8, 4  ;;  %s1136_s10 = smov 64   ;;  %s174_s9 = int_to_ptr.vmem [resolvable:$true] %s173_s9 }
   0xf   : > { %p986_p11 = pneg %p161_p10  ;;  %s1137_s11 = smov 4  }
  0x10   : > { %206 = sbr.rel (%p161_p10) target bundleno = 622 (0x26e), region = 40 }
  0x11   : > { %p987_p12 = pnand %p994_p9, %p986_p11 }
  0x13   : > { %989 = dma.hbm_to_vmem [thread:$0]  (!%p987_p12), %s172_s7, 2816, %s174_s9, [#allocation3], %s1136_s10, %s1136_s10, %s1137_s11  }
  0x15   : > { %1112 = dma.done.wait (%p994_p9), [#allocation3], 2816  }
  0x16   : > { %1114 = vsyncadd (%p994_p9), [#allocation3], 4294964480  ;;  %p234_p13 = scmp.lt.s32.totalorder %s1189_s22, 1  ;;  %v958_v0 = vld [vmem:[#allocation2 + $0x8] sm:$0xff]  ;;  %v960_v2 = vld [vmem:[#allocation2 + $0x18] sm:$0xff]  ;;  %vm275_vm0 = vcmask 261120   ;;  %s777_s8 = scalar_lea.hbm %s1339_s5, %s1189_s22 }
  0x17   : > { %v962_v1 = vld [vmem:[#allocation2 + $0x28] sm:$0xff]  ;;  %v964_v3 = vld [vmem:[#allocation2 + $0x38] sm:$0xff]  ;;  %v957_v4 = vld [vmem:[#allocation2] sm:$0xff]  ;;  %313 = vmatpush.bf16.msra.mxu1 %v958_v0  ;;  %285 = vmatpush.bf16.msra.mxu0 %v960_v2  ;;  %vm702_vm1 = vcmask 523264   ;;  %vm742_vm2 = vcmask 24576   ;;  %s232_s30 = sand.u32 1, %s1125_s19  }
  0x18   : > { %s235_s12 = scalar_select %p234_p13, %s1189_s22, 1  ;;  %351 = vmatpush.bf16.msra.mxu2 %v962_v1  ;;  %v961_v5 = vld [vmem:[#allocation2 + $0x20] sm:$0xff]  ;;  %v959_v6 = vld [vmem:[#allocation2 + $0x10] sm:$0xff]  ;;  %397 = vmatpush.bf16.msra.mxu3 %v964_v3  ;;  %v970_v14 = vld [vmem:[#allocation2 + $0x68] sm:$0xff] }
  0x19   : > { %v963_v8 = vld [vmem:[#allocation2 + $0x30] sm:$0xff]  ;;  %v966_v16 = vld [vmem:[#allocation2 + $0x48] sm:$0xff]  ;;  %v972_v18 = vld [vmem:[#allocation2 + $0x78] sm:$0xff]  ;;  %s233_s9 = scalar_lea.vmem [#allocation5], %s232_s30  ;;  %s781_s11 = sshll.u32 %s777_s8, 4  ;;  %s782_s11 = int_to_ptr.hbm [resolvable:$true] %s781_s11 }
  0x1a   : > { %s979_s13 = smul.u32 12, %s235_s12  ;;  %v968_v21 = vld [vmem:[#allocation2 + $0x58] sm:$0xff]  ;;  %v969_v24 = vld [vmem:[#allocation2 + $0x60] sm:$0xff]  ;;  %v971_v36 = vld [vmem:[#allocation2 + $0x70] sm:$0xff]  ;;  %s779_s10 = sshll.u32 %s233_s9, 4  ;;  %s780_s10 = int_to_ptr.vmem [resolvable:$true] %s779_s10 }
  0x1b   : > { %314 = vmatpush.bf16.msra.mxu1 %v957_v4  ;;  %286 = vmatpush.bf16.msra.mxu0 %v959_v6  ;;  %v965_v31 = vld [vmem:[#allocation2 + $0x40] sm:$0xff]  ;;  %v978_v37 = vld [vmem:[#allocation2 + $0xa8] sm:$0xff]  ;;  %v967_v39 = vld [vmem:[#allocation2 + $0x50] sm:$0xff]  ;;  %s769_s12 = scalar_lea.sflag [#allocation4], %s232_s30 }
  0x1c   : > { %s1231_s16 = scalar_lea.vmem %s1334_s0, %s979_s13  ;;  %352 = vmatpush.bf16.msra.mxu2 %v961_v5  ;;  %398 = vmatpush.bf16.msra.mxu3 %v963_v8  ;;  %v974_v45 = vld [vmem:[#allocation2 + $0x88] sm:$0xff]  ;;  %v976_v47 = vld [vmem:[#allocation2 + $0x98] sm:$0xff]  ;;  %v977_v51 = vld [vmem:[#allocation2 + $0xa0] sm:$0xff]  ;;  %s1081_s13 = sshra.s32 %s782_s11, 4  ;;  %s1082_s13 = int_to_ptr.hbm [resolvable:$true] %s1081_s13 }
  0x1d   : > { %v240_v7 = vld [vmem:[%s1231_s16] sm:$0xf]  ;;  %v245_v9 = vld [vmem:[%s1231_s16 + $0x4] sm:$0x1]  ;;  %v975_v54 = vld [vmem:[#allocation2 + $0x90] sm:$0xff]  ;;  %s1083_s22 = scalar_lea.hbm %s1082_s13, 1  ;;  %p1088_p3 = scmp.lt.s32.totalorder %s1082_s13, %s1339_s5 }
  0x1e   : > { %v253_v10 = vunpack.c.l.b16 %v240_v7  ;;  %v320_v11 = vld [vmem:[%s1231_s16] sm:$0xe]  ;;  %v254_v12 = vunpack.c.l.b16 %v245_v9  ;;  %v1237_v15 = vld [vmem:[%s1231_s16 + $0x4] sm:$0x3]  ;;  %872 = vmatmul.msk.bf16.vlgmr.msra.gmra.mxu1 %vm275_vm0, %v240_v7  ;;  %v610_v59 = vld [vmem:[%s1231_s16 + $0x8] sm:$0x1]  ;;  %p1084_p0 = scmp.ne.s32.totalorder %s1082_s13, %s1083_s22 }
  0x1f   : > { %v327_v13 = vunpack.c.l.b16 %v320_v11  ;;  %v366_v17 = vunpack.c.l.b16 %v1237_v15  ;;  %v1241_v22 = vld [vmem:[%s1231_s16] sm:$0xc]  ;;  %v444_v26 = vld [vmem:[%s1231_s16 + $0x4] sm:$0x7]  ;;  %436 = vmatpush.bf16.msrb.mxu0 %v966_v16  ;;  %482 = vmatpush.bf16.msrb.mxu1 %v968_v21  ;;  %v619_v0 = vunpack.c.l.b16 %v610_v59 }
  0x20   : > { %v255_v19 = vpack.c.b16 %v254_v12, %v253_v10  ;;  %v412_v25 = vunpack.c.l.b16 %v1241_v22  ;;  %v490_v27 = vld [vmem:[%s1231_s16] sm:$0x8]  ;;  %521 = vmatpush.bf16.msrb.mxu2 %v970_v14  ;;  %v451_v32 = vunpack.c.l.b16 %v444_v26  ;;  %v1249_v33 = vld [vmem:[%s1231_s16 + $0x4] sm:$0xf]  ;;  %567 = vmatpush.bf16.msrb.mxu3 %v972_v18  ;;  %v717_v22 = vld [vmem:[%s1337_s3 + $0x38] sm:$0xff]  ;;  %p1085_p1 = pnand %p1084_p0, %p1206_p5 }
  0x21   : > { %v328_v20 = vpack.c.b16 %v254_v12, %v327_v13  ;;  %v367_v23 = vpack.c.b16 %v366_v17, %v327_v13  ;;  %v497_v43 = vunpack.c.l.b16 %v490_v27  ;;  %v536_v44 = vunpack.c.l.b16 %v1249_v33  ;;  %v973_v53 = vld [vmem:[#allocation2 + $0x80] sm:$0xff]  ;;  %v716_v26 = vld [vmem:[%s1337_s3 + $0x30] sm:$0xff] }
  0x22   : > { %v257_v29 = vshrl.u32 %v255_v19, 16  ;;  %v259_v30 = vshll.u32 %v255_v19, 16  ;;  %v452_v40 = vpack.c.b16 %v451_v32, %v412_v25  ;;  %v609_v58 = vld [vmem:[%s1231_s16 + $0x4] sm:$0xf]  ;;  %v413_v2 = vpack.c.b16 %v366_v17, %v412_v25  ;;  %p1086_p2 = pneg %p1085_p1 }
  0x23   : > { %v329_v28 = vrot.slane %v328_v20, 1  ;;  %v369_v34 = vshrl.u32 %v367_v23, 16  ;;  %v372_v35 = vshll.u32 %v367_v23, 16  ;;  %437 = vmatpush.bf16.msrb.mxu0 %v965_v31  ;;  %483 = vmatpush.bf16.msrb.mxu1 %v967_v39  ;;  %v537_v52 = vpack.c.b16 %v536_v44, %v497_v43  ;;  %v657_v8 = vld [vmem:[%s1231_s16 + $0x4] sm:$0xe]  ;;  %s1087_s16 = scalar_lea.hbm %s1339_s5, 2 }
  0x24   : > { %v261_v38 = vrot.slane %v259_v30, 1  ;;  %522 = vmatpush.bf16.msrb.mxu2 %v969_v24  ;;  %568 = vmatpush.bf16.msrb.mxu3 %v971_v36  ;;  %v454_v49 = vshrl.u32 %v452_v40, 16  ;;  %v457_v50 = vshll.u32 %v452_v40, 16  ;;  %v498_v57 = vpack.c.b16 %v451_v32, %v497_v43  ;;  %v714_v30 = vld [vmem:[%s1337_s3 + $0x20] sm:$0xff]  ;;  %p1089_p4 = scmp.lt.s32.totalorder %s1087_s16, %s1083_s22 }
  0x25   : > { %881 = vmatmul.msk.bf16.vlgmr.msra.gmra.mxu2 %vm275_vm0, %v329_v28  ;;  %v371_v41 = vrot.slane %v369_v34, 1  ;;  %v374_v42 = vrot.slane %v372_v35, 2  ;;  %v539_v60 = vshrl.u32 %v537_v52, 16  ;;  %v542_v61 = vshll.u32 %v537_v52, 16  ;;  %v715_v28 = vld [vmem:[%s1337_s3 + $0x28] sm:$0xff]  ;;  %v710_v39 = vld [vmem:[%s1337_s3] sm:$0xff] }
  0x26   : > { %v262_v46 = vor.u32 %v261_v38, %v257_v29  ;;  %v456_v55 = vrot.slane %v454_v49, 2  ;;  %v459_v56 = vrot.slane %v457_v50, 3  ;;  %v618_v63 = vunpack.c.l.b16 %v609_v58  ;;  %v711_v38 = vld [vmem:[%s1337_s3 + $0x8] sm:$0xff]  ;;  %v1032_v52 = vld [vmem:[%s1336_s2] ss:$0 sm:$0xff]  ;;  %p1090_p7 = por %p1089_p4, %p1088_p3 }
  0x27   : > { %v375_v48 = vor.u32 %v374_v42, %v371_v41  ;;  %649 = vmatpush.bf16.msra.mxu1 %v976_v47  ;;  %v499_v1 = vrot.slane %v498_v57, 3  ;;  %v541_v3 = vrot.slane %v539_v60, 3  ;;  %v544_v4 = vrot.slane %v542_v61, 4 }
  0x28   : > { %688 = vmatpush.bf16.msra.mxu2 %v978_v37  ;;  %863 = vmatmul.msk.bf16.vlgmr.msra.gmra.mxu0 %vm275_vm0, %v262_v46  ;;  %v460_v62 = vor.u32 %v459_v56, %v456_v55  ;;  %v620_v5 = vpack.c.b16 %v619_v0, %v618_v63  ;;  %v414_v6 = vrot.slane %v413_v2, 2  ;;  %v664_v10 = vunpack.c.l.b16 %v657_v8  ;;  %v712_v37 = vld [vmem:[%s1337_s3 + $0x10] sm:$0xff]  ;;  %v718_v2 = vld [vmem:[%s1338_s4] sm:$0x1]  ;;  %p1091_p8 = pnand %p1090_p7, %p1086_p2 }
  0x29   : > { %890 = vmatmul.msk.bf16.vlgmr.msra.gmra.mxu3 %vm275_vm0, %v375_v48  ;;  %601 = vmatpush.bf16.msra.mxu0 %v974_v45  ;;  %v545_v7 = vor.u32 %v544_v4, %v541_v3 }
  0x2a   : > { %v624_v9 = vshll.u32 %v620_v5, 16  ;;  %v622_v11 = vshrl.u32 %v620_v5, 16  ;;  %v665_v13 = vpack.c.b16 %v619_v0, %v664_v10  ;;  %730 = vmatpush.msra.mxu3 %v717_v22 }
  0x2b   : > { %650 = vmatpush.bf16.msra.mxu1 %v975_v54 }
  0x2c   : > { %689 = vmatpush.bf16.msra.mxu2 %v977_v51  ;;  %v626_v12 = vrot.slane %v624_v9, 1  ;;  %v666_v15 = vrot.slane %v665_v13, 1  ;;  %731 = vmatpush.msra.mxu3 %v716_v26 }
  0x2d   : > { %602 = vmatpush.bf16.msra.mxu0 %v973_v53 }
  0x2e   : > { %908 = vmatmul.msk.bf16.vlgmr.msrb.gmra.mxu1 %vm275_vm0, %v460_v62  ;;  %v627_v14 = vor.u32 %v626_v12, %v622_v11  ;;  %732 = vmatpush.msra.mxu3 %v715_v28 }
  0x30   : > { %733 = vmatpush.msra.mxu3 %v714_v30 }
  0x35   : > { %917 = vmatmul.msk.bf16.vlgmr.msrb.gmra.mxu2 %vm275_vm0, %v499_v1 }
  0x38   : > { %899 = vmatmul.msk.bf16.vlgmr.msrb.gmra.mxu0 %vm275_vm0, %v414_v6 }
  0x39   : > { %926 = vmatmul.msk.bf16.vlgmr.msrb.gmra.mxu3 %vm275_vm0, %v545_v7 }
  0x3e   : > { %944 = vmatmul.msk.bf16.vlgmr.msra.gmra.mxu1 %vm275_vm0, %v627_v14 }
  0x45   : > { %953 = vmatmul.msk.bf16.vlgmr.msra.gmra.mxu2 %vm275_vm0, %v666_v15 }
  0x48   : > { %935 = vmatmul.msk.bf16.vlgmr.msra.gmra.mxu0 %vm275_vm0, %v1249_v33  ;;  %v713_v33 = vld [vmem:[%s1337_s3 + $0x18] sm:$0xff] }
  0x49   : > { %734 = vmatpush.msra.mxu3 %v713_v33 }
  0x4b   : > { %735 = vmatpush.msra.mxu3 %v712_v37 }
  0x4d   : > { %736 = vmatpush.msra.mxu3 %v711_v38 }
  0x4f   : > { %737 = vmatpush.msra.mxu3 %v710_v39 }
  0x9b   : > { %v316_v16 = vpop.f32.mrf.mxu1 }
  0xa3   : > { %v318_v19 = vpop.f32.mrf.mxu1 }
  0xa5   : > { %v288_v17 = vpop.f32.mrf.mxu0 }
  0xa6   : > { %v317_v24 = vadd.f32 %v316_v16, %v288_v17 }
  0xa8   : > { %v354_v18 = vpop.f32.mrf.mxu2 }
  0xa9   : > { %v358_v27 = vadd.f32 %v354_v18, %v317_v24 }
  0xab   : > { %v485_v25 = vpop.f32.mrf.mxu1 }
  0xac   : > { %v400_v20 = vpop.f32.mrf.mxu3 }
  0xad   : > { %v290_v21 = vpop.f32.mrf.mxu0  ;;  %v404_v32 = vadd.f32 %v400_v20, %v358_v27 }
  0xb0   : > { %v356_v23 = vpop.f32.mrf.mxu2 }
  0xb3   : > { %v487_v36 = vpop.f32.mrf.mxu1 }
  0xb4   : > { %v402_v29 = vpop.f32.mrf.mxu3 }
  0xb5   : > { %v439_v31 = vpop.f32.mrf.mxu0 }
  0xb6   : > { %v443_v35 = vadd.f32 %v439_v31, %v404_v32 }
  0xb8   : > { %v524_v34 = vpop.f32.mrf.mxu2  ;;  %v489_v40 = vadd.f32 %v485_v25, %v443_v35 }
  0xba   : > { %v528_v44 = vadd.f32 %v524_v34, %v489_v40 }
  0xbb   : > { %v652_v45 = vpop.f32.mrf.mxu1 }
  0xbc   : > { %v570_v41 = vpop.f32.mrf.mxu3 }
  0xbd   : > { %v441_v42 = vpop.f32.mrf.mxu0  ;;  %v574_v46 = vadd.f32 %v570_v41, %v528_v44 }
  0xc0   : > { %v526_v43 = vpop.f32.mrf.mxu2 }
  0xc3   : > { %v654_v53 = vpop.f32.mrf.mxu1 }
  0xc4   : > { %v572_v47 = vpop.f32.mrf.mxu3 }
  0xc5   : > { %v604_v48 = vpop.f32.mrf.mxu0 }
  0xc6   : > { %v608_v49 = vadd.f32 %v604_v48, %v574_v46 }
  0xc8   : > { %v691_v50 = vpop.f32.mrf.mxu2  ;;  %v656_v51 = vadd.f32 %v652_v45, %v608_v49 }
  0xca   : > { %v695_v54 = vadd.f32 %v691_v50, %v656_v51 }
  0xcc   : > { %v700_v55 = vadd.f32 %v1032_v52, %v695_v54 }
  0xcd   : > { %v606_v56 = vpop.f32.mrf.mxu0 }
  0xce   : > { %v701_v57 = vmax.f32 %v700_v55, 0.0 }
  0xd0   : > { %v693_v58 = vpop.f32.mrf.mxu2  ;;  %v703_v59 = vsel %vm702_vm1, %v701_v57, -inf }
  0xd1   : > { %v704_v60 = vrot.slane %v703_v59, 4 }
  0xd3   : > { %v705_v61 = vmax.f32 %v703_v59, %v704_v60 }
  0xd5   : > { %v706_v62 = vrot.slane %v705_v61, 2 }
  0xd7   : > { %v707_v63 = vmax.f32 %v705_v61, %v706_v62 }
  0xd9   : > { %v708_v0 = vrot.slane %v707_v63, 1 }
  0xdb   : > { %v709_v1 = vmax.f32 %v707_v63, %v708_v0 }
  0xdd   : > { %954 = vmatmul.msk.f32.vlgmr.msra.gmra.mxu3 %vm702_vm1, %v709_v1 }
 0x160   : > { %v739_v3 = vpop.f32.mrf.mxu3 }
 0x161   : > { %v740_v4 = vadd.f32 %v739_v3, %v718_v2 }
 0x163   : > { %v743_v5 = vsel %vm742_vm2, %v740_v4, -inf }
 0x164   : > { %744 = vmax.xlane.f32.xlu0 %v743_v5 }
 0x1d7   : > { %v745_v6 = vpop.xlane.xlu0 %744 }
 0x1d8   : > { %v746_v7 = vsub.f32 %v740_v4, %v745_v6 }
 0x1da   : > { %v747_v8 = vmul.f32 1.442695, %v746_v7 }
 0x1dc   : > { %1033 = vpow2.f32 %v747_v8 }
 0x1e2   : > { %v1034_v9 = vpop.eup %1033 }
 0x1e3   : > { %v749_v10 = vsel %vm742_vm2, %v1034_v9, 0.0 }
 0x1e4   : > { %750 = vadd.xlane.f32.xlu0 %v749_v10 }
 0x257   : > { %v751_v11 = vpop.xlane.xlu0 %750 }
 0x258   : > { %1035 = vrcp.f32 %v751_v11  ;;  %v763_v15 = vand.u32 2147483648, %v751_v11  ;;  %v761_v17 = vand.u32 2147483647, %v751_v11  ;;  %vm757_vm4 = vweird.f32 %v751_v11 }
 0x25a   : > { %v764_v19 = vor.u32 1.1754944e-38, %v763_v15  ;;  %vm762_vm6 = vcmp.eq.f32.partialorder %v761_v17, 8.507059e+37 }
 0x25e   : > { %v1036_v12 = vpop.eup %1035 }
 0x25f   : > { %v753_v13 = vmul.f32 %v1036_v12, %v751_v11  ;;  %vm758_vm3 = vweird.f32 %v1036_v12 }
 0x260   : > { %vm759_vm5 = vmor %vm757_vm4, %vm758_vm3 }
 0x261   : > { %v754_v14 = vsub.f32 1.0, %v753_v13 }
 0x263   : > { %v755_v16 = vmul.f32 %v1036_v12, %v754_v14 }
 0x265   : > { %v756_v18 = vadd.f32 %v1036_v12, %v755_v16 }
 0x267   : > { %v760_v20 = vsel %vm759_vm5, %v1036_v12, %v756_v18 }
 0x268   : > { %v765_v21 = vsel %vm762_vm6, %v764_v19, %v760_v20 }
 0x269   : > { %v766_v22 = vmul.f32 %v1034_v9, %v765_v21 }
 0x26b   : > { %767 = vst.msk [vmem:[%s233_s9] sm:$0x1] %vm742_vm2, %v766_v22 }
 0x26c   : > { %1094 = shalt.err (!%p1091_p8)
}
 0x26d   : > { %984 = dma.vmem_to_hbm [thread:$0]  (%p1206_p5), %s780_s10, 16, %s782_s11, %s769_s12  }
 0x26e PF: > { %p996_p9 = scmp.ge.s32.totalorder %s1133_s21, 2  ;;  %s793_s25 = sand.u32 1, %s1121_s18  }
 0x26f   : > { %s794_s26 = scalar_lea.sflag [#allocation4], %s793_s25 }
 0x270   : > { %p991_p10 = pnand %p996_p9, %p1210_p6 }
 0x272   : > { %p992_p11 = pneg %p991_p10 }
 0x274   : > { %1116 = dma.done.wait (%p992_p11), %s794_s26, 16  }
 0x275   : > { %1118 = vsyncadd (%p992_p11), %s794_s26, 4294967280  ;;  %p16_p12 = scmp.ge.s32.totalorder %s1193_s24, 4   ;;  %s1342_s18 = smov %s1125_s19 }
 0x276   : > { %s1343_s19 = smov %s1129_s20  ;;  %s1344_s20 = smov %s1204_s27 }
 0x277   : > { %s1345_s21 = smov %s1193_s24  ;;  %18 = sbr.rel (!%p16_p12) target bundleno = 4 (0x4), region = 90 }
 0x27c   :  { %799 = vsyncpa [#allocation3], 1 }
 0x27d   :  { %801 = vsyncpa [#allocation3 + $0x1], 1 }
 0x27e   :  { %802 = vsyncpa [#allocation4], 1 }
 0x27f   :  { %804 = vsyncpa [#allocation4 + $0x1], 1 }

</bundles_post_ra>
